<compile_context>
chip_gen: v6e
topology: v6e:2x2x1
jax: 0.10.0
libtpu: 0.0.40
codegen_flags: <defaults>
</compile_context>

<pallas_src>
import math
from functools import partial

import numpy as np
import jax
import jax.numpy as jnp
from jax.experimental import pallas as pl
from jax.experimental.pallas import tpu as pltpu

MXU_DTYPE = jnp.bfloat16               # MXU operand dtype (accumulation is always f32)
ROW_TARGET = 512                       # target rows (Bt*S) per grid step
RESIDENT_WEIGHT_BYTES = 8 * 1024 * 1024  # keep all layers' weights resident below this


# ----------------------------- in-kernel helpers -----------------------------

def _layer_norm(x, gamma, beta, eps=1e-5):
    # x: (rows, E); gamma/beta: (1, E). Matches torch.nn.LayerNorm(E) (biased var, eps=1e-5).
    mu = jnp.mean(x, axis=-1, keepdims=True)
    var = jnp.mean((x - mu) ** 2, axis=-1, keepdims=True)
    return (x - mu) * jax.lax.rsqrt(var + eps) * gamma + beta


def fused_encoder_kernel(n_heads, embed_scale, weights_resident,
                         emb_ref, pe_ref,
                         wqkv_ref, wo_ref, bo_ref,
                         g1_ref, be1_ref, g2_ref, be2_ref,
                         w1_ref, bb1_ref, w2_ref, bb2_ref,
                         o_ref):
    """Grid = (batch_tile, layer). Activation is carried in the resident o_ref block."""
    layer = pl.program_id(1)

    def W(ref):
        # Resident weights hold all layers (L, ...): dynamic-index the layer axis.
        return ref[layer] if weights_resident else ref[0]

    @pl.when(layer == 0)
    def _():
        # word-embedding scale + positional encoding, fused into the first layer step
        o_ref[...] = (emb_ref[...].astype(jnp.float32) * embed_scale
                      + pe_ref[...].astype(jnp.float32)[None, :, :]).astype(o_ref.dtype)

    x = o_ref[...]                                     # (Bt, S, E) f32 carried activation
    Bt, S, E = x.shape
    H = n_heads
    d = E // H
    rows = Bt * S

    x2 = x.reshape(rows, E)
    xb = x2.astype(MXU_DTYPE)

    # ---- multi-head self-attention (tutorial-style shared (d,d) per-head projections) ----
    # wqkv = [wq/sqrt(d) | wk | wv] : one fused contraction instead of three skinny ones.
    # TODO(synk): for large S, block attention over keys (flash/online-softmax) so the (S,S)
    # temporaries never materialize in VMEM (required to fit v7x's 64 MiB for S >= ~1k).
    wqkv = W(wqkv_ref)                                                # (d, 3d) bf16
    xh = xb.reshape(rows * H, d)
    qkv = jnp.dot(xh, wqkv, preferred_element_type=jnp.float32)      # (rows*H, 3d) f32

    if H == 1:
        q = qkv[:, 0:d].reshape(Bt, S, d).astype(MXU_DTYPE)
        k = qkv[:, d:2 * d].reshape(Bt, S, d).astype(MXU_DTYPE)
        v = qkv[:, 2 * d:3 * d].reshape(Bt, S, d).astype(MXU_DTYPE)
        s = jnp.einsum('bqd,bkd->bqk', q, k, preferred_element_type=jnp.float32)
        s = s - jnp.max(s, axis=-1, keepdims=True)                   # stable softmax in f32
        p = jnp.exp(s)
        l = jnp.sum(p, axis=-1, keepdims=True)
        ctx = jnp.einsum('bqk,bkd->bqd', p.astype(MXU_DTYPE), v,
                         preferred_element_type=jnp.float32)
        ctx = ctx * pl.reciprocal(l, approx=True)                    # deferred normalization
        attn_out = (jnp.dot(ctx.reshape(rows, E).astype(MXU_DTYPE), W(wo_ref),
                            preferred_element_type=jnp.float32)
                    + W(bo_ref).astype(jnp.float32))                 # (rows, E)
    else:
        # Head axis stays a batch dim; head-merge is folded into the output projection.
        qkv4 = qkv.reshape(Bt, S, H, 3 * d)
        q = qkv4[..., 0:d].astype(MXU_DTYPE)
        k = qkv4[..., d:2 * d].astype(MXU_DTYPE)
        v = qkv4[..., 2 * d:3 * d].astype(MXU_DTYPE)
        s = jnp.einsum('bqhd,bkhd->bhqk', q, k, preferred_element_type=jnp.float32)
        s = s - jnp.max(s, axis=-1, keepdims=True)
        p = jnp.exp(s)
        p = p * pl.reciprocal(jnp.sum(p, axis=-1, keepdims=True), approx=True)
        ctx = jnp.einsum('bhqk,bkhd->bqhd', p.astype(MXU_DTYPE), v,
                         preferred_element_type=jnp.float32)         # (Bt, S, H, d)
        wo3 = W(wo_ref).reshape(H, d, E)
        attn_out = (jnp.einsum('bqhd,hde->bqe', ctx.astype(MXU_DTYPE), wo3,
                               preferred_element_type=jnp.float32).reshape(rows, E)
                    + W(bo_ref).astype(jnp.float32))

    # ---- residual + norm1 ----
    # TODO(synk): nn.Dropout(0.2) layers are treated as eval-mode identity (no stochastic mask).
    norm1 = _layer_norm(attn_out + x2,
                        W(g1_ref).astype(jnp.float32), W(be1_ref).astype(jnp.float32))

    # ---- feed-forward: Linear -> ReLU -> Linear ----
    h1 = (jnp.dot(norm1.astype(MXU_DTYPE), W(w1_ref), preferred_element_type=jnp.float32)
          + W(bb1_ref).astype(jnp.float32))                           # (rows, 4E)
    h1 = jnp.maximum(h1, 0.0)
    ff = (jnp.dot(h1.astype(MXU_DTYPE), W(w2_ref), preferred_element_type=jnp.float32)
          + W(bb2_ref).astype(jnp.float32))                           # (rows, E)

    # ---- residual + norm2; carry in the resident output block (HBM write once per tile) ----
    out2 = _layer_norm(ff + norm1,
                       W(g2_ref).astype(jnp.float32), W(be2_ref).astype(jnp.float32))
    o_ref[...] = out2.reshape(Bt, S, E).astype(o_ref.dtype)


# ------------------------------ pallas_call glue ------------------------------

def _num_tensorcores():
    """Best-effort TensorCores-per-chip (v7x has 2; v5e/v6e have 1)."""
    try:
        kind = (jax.devices()[0].device_kind or "").lower()
        if "v7" in kind:
            return 2
    except Exception:
        pass
    return 1


def _pick_batch_tile(batch, seq_len, num_tc):
    """Biggest divisor of batch with Bt*S <= ROW_TARGET. Only force >= num_tc grid steps on
    multi-TC chips; on single-TC v5e/v6e splitting just shrinks the MXU M dim."""
    bt = 1
    for cand in range(1, batch + 1):
        if batch % cand == 0 and cand * seq_len <= max(ROW_TARGET, seq_len):
            bt = cand
    if num_tc >= 2 and batch // bt < num_tc:
        for cand in range(bt, 0, -1):
            if batch % cand == 0 and batch // cand >= num_tc:
                bt = cand
                break
    return bt


def transformer_encoder_pallas(emb, pe, lp, n_heads, *, batch_tile=None, vmem_limit_bytes=None):
    """emb: (B, S, E) bf16 gathered embeddings; lp: dict of layer-stacked params (leading L)."""
    B, S, E = emb.shape
    L, d, _ = lp["wqkv"].shape
    assert d == E // n_heads
    Eff = lp["w1"].shape[-1]

    num_tc = _num_tensorcores()
    Bt = batch_tile or _pick_batch_tile(B, S, num_tc)
    assert B % Bt == 0
    if vmem_limit_bytes is None:
        # dual-TC v7x has 64 MiB/TC (keep headroom); single-TC v5e/v6e have 128 MiB.
        vmem_limit_bytes = (48 if num_tc >= 2 else 96) * 1024 * 1024

    weight_bytes = sum(int(np.prod(v.shape)) * v.dtype.itemsize for v in lp.values())
    weights_resident = weight_bytes <= RESIDENT_WEIGHT_BYTES

    def wspec(trailing, buffers=None):
        nd = len(trailing)
        if weights_resident:
            # All layers resident in VMEM: constant index_map -> weights DMA'd once per call.
            return pl.BlockSpec((L,) + tuple(trailing), lambda bt, l: (0,) * (1 + nd))
        kwargs = {}
        if buffers is not None:
            kwargs = dict(pipeline_mode=pl.Buffered(buffers))
        return pl.BlockSpec((1,) + tuple(trailing), lambda bt, l: (l,) + (0,) * nd, **kwargs)

    kernel = partial(fused_encoder_kernel, n_heads, math.sqrt(E), weights_resident)

    return pl.pallas_call(
        kernel,
        out_shape=jax.ShapeDtypeStruct((B, S, E), jnp.float32),
        grid_spec=pltpu.PrefetchScalarGridSpec(
            num_scalar_prefetch=0,
            grid=(B // Bt, L),
            in_specs=[
                # NOTE: for real configs E should be a multiple of 128 so activation blocks and
                # the output store are lane-dense; small-E test shapes tolerate masked lanes.
                pl.BlockSpec((Bt, S, E), lambda bt, l: (bt, 0, 0)),   # emb (constant over l)
                pl.BlockSpec((S, E), lambda bt, l: (0, 0)),           # positional encoding
                wspec((d, 3 * d)),                                    # fused wqkv (scale folded)
                wspec((E, E)), wspec((1, E)),                         # wo, bo
                wspec((1, E)), wspec((1, E)),                         # ln1 gamma, beta
                wspec((1, E)), wspec((1, E)),                         # ln2 gamma, beta
                wspec((E, Eff), buffers=3), wspec((1, Eff)),          # ff w1, b1
                wspec((Eff, E), buffers=3), wspec((1, E)),            # ff w2, b2
            ],
            out_specs=pl.BlockSpec((Bt, S, E), lambda bt, l: (bt, 0, 0)),
        ),
        compiler_params=pltpu.CompilerParams(
            dimension_semantics=("parallel", "arbitrary"),
            vmem_limit_bytes=vmem_limit_bytes),
    )(emb, pe,
      lp["wqkv"], lp["wo"], lp["bo"],
      lp["g1"], lp["be1"], lp["g2"], lp["be2"],
      lp["w1"], lp["bb1"], lp["w2"], lp["bb2"])


def positional_encoding(seq_len, embed_dim):
    # Tutorial PositionalEmbedding table:
    #   pe[pos, c] = sin(pos / 10000**(2c/E)) for even c, cos(pos / 10000**(2c/E)) for odd c.
    pos = np.arange(seq_len, dtype=np.float64)[:, None]
    col = np.arange(embed_dim, dtype=np.float64)[None, :]
    angle = pos / np.power(10000.0, (2.0 * col) / embed_dim)
    pe = np.where(col % 2 == 0, np.sin(angle), np.cos(angle))
    return jnp.asarray(pe, dtype=jnp.float32)


def init_params(key, seq_len, vocab_size, embed_dim, num_layers, expansion_factor, n_heads):
    d = embed_dim // n_heads
    e_ff = expansion_factor * embed_dim
    keys = jax.random.split(key, 1 + num_layers)

    def lin(k, out_f, in_f, scale=None):
        scale = scale if scale is not None else 1.0 / math.sqrt(in_f)
        return jax.random.uniform(k, (out_f, in_f), jnp.float32, -1.0, 1.0) * scale

    layers = []
    for li in range(num_layers):
        lk = jax.random.split(keys[1 + li], 14)
        # matmul weights pre-transposed to (in_features, out_features), stored bf16.
        # Q/K/V fused into one (d, 3d) matrix; the 1/sqrt(d) attention scale is folded into
        # the Q columns so the kernel never multiplies the (S, S) score tensor.
        wq = lin(lk[0], d, d).T * (1.0 / math.sqrt(d))
        wk = lin(lk[1], d, d).T
        wv = lin(lk[2], d, d).T
        layers.append({
            "wqkv": jnp.concatenate([wq, wk, wv], axis=1).astype(MXU_DTYPE),
            "wo": lin(lk[3], embed_dim, embed_dim).T.astype(MXU_DTYPE),
            "bo": lin(lk[4], 1, embed_dim),
            "g1": jnp.ones((1, embed_dim), jnp.float32) + 0.1 * lin(lk[5], 1, embed_dim, 1.0),
            "be1": 0.1 * lin(lk[6], 1, embed_dim, 1.0),
            "g2": jnp.ones((1, embed_dim), jnp.float32) + 0.1 * lin(lk[7], 1, embed_dim, 1.0),
            "be2": 0.1 * lin(lk[8], 1, embed_dim, 1.0),
            "w1": lin(lk[9], e_ff, embed_dim).T.astype(MXU_DTYPE),
            "bb1": lin(lk[10], 1, e_ff),
            "w2": lin(lk[11], embed_dim, e_ff).T.astype(MXU_DTYPE),
            "bb2": 0.01 * lin(lk[12], 1, embed_dim, 1.0),
        })

    stacked = {name: jnp.stack([lyr[name] for lyr in layers], axis=0) for name in layers[0]}

    return {
        "embedding": jax.random.normal(keys[0], (vocab_size, embed_dim), jnp.float32),
        "pe": positional_encoding(seq_len, embed_dim),
        "layers": stacked,
    }


def transformer_encoder(tokens, params, n_heads):
    # Token-id gather stays as XLA glue; the * sqrt(E) scale and positional add are fused into
    # layer 0 of the Pallas kernel.  Embeddings / PE cross HBM in bf16 (halves the streamed
    # activation DMA); all non-MXU math inside the kernel is f32.
    # TODO(synk): fuse the embedding gather itself (scalar-prefetch token ids + Element BlockSpec).
    emb = jnp.take(params["embedding"], tokens, axis=0).astype(MXU_DTYPE)   # (B, S, E) bf16
    pe = params["pe"].astype(MXU_DTYPE)
    return transformer_encoder_pallas(emb, pe, params["layers"], n_heads)


if __name__ == "__main__":
    SEQ_LEN = 8
    VOCAB = 50
    EMBED_DIM = 32
    NUM_LAYERS = 2
    EXPANSION = 4
    N_HEADS = 1          # TransformerEncoder default n_head=1
    BATCH = 2

    key = jax.random.PRNGKey(0)
    pkey, tkey = jax.random.split(key)
    params = init_params(pkey, SEQ_LEN, VOCAB, EMBED_DIM, NUM_LAYERS, EXPANSION, N_HEADS)
    tokens = jax.random.randint(tkey, (BATCH, SEQ_LEN), 0, VOCAB, dtype=jnp.int32)

    run = jax.jit(transformer_encoder, static_argnums=2)
    out = run(tokens, params, N_HEADS)
    out = jax.block_until_ready(out)

    assert out.shape == (BATCH, SEQ_LEN, EMBED_DIM), out.shape
    assert bool(jnp.all(jnp.isfinite(out)))
    print("KERNEL_OK")
</pallas_src>

<mosaic_0001>
module attributes {stable_mosaic.version = 11 : i64} {
  func.func @fused_encoder_kernel(%arg0: i32, %arg1: i32, %arg2: memref<2x8x32xbf16, #tpu.memory_space<vmem>>, %arg3: memref<8x32xbf16, #tpu.memory_space<vmem>>, %arg4: memref<2x32x96xbf16, #tpu.memory_space<vmem>>, %arg5: memref<2x32x32xbf16, #tpu.memory_space<vmem>>, %arg6: memref<2x1x32xf32, #tpu.memory_space<vmem>>, %arg7: memref<2x1x32xf32, #tpu.memory_space<vmem>>, %arg8: memref<2x1x32xf32, #tpu.memory_space<vmem>>, %arg9: memref<2x1x32xf32, #tpu.memory_space<vmem>>, %arg10: memref<2x1x32xf32, #tpu.memory_space<vmem>>, %arg11: memref<2x32x128xbf16, #tpu.memory_space<vmem>>, %arg12: memref<2x1x128xf32, #tpu.memory_space<vmem>>, %arg13: memref<2x128x32xbf16, #tpu.memory_space<vmem>>, %arg14: memref<2x1x32xf32, #tpu.memory_space<vmem>>, %arg15: memref<2x8x32xf32, #tpu.memory_space<vmem>>) attributes {dimension_semantics = [#tpu.dimension_semantics<parallel>, #tpu.dimension_semantics<arbitrary>], iteration_bounds = array<i64: 1, 2>, scalar_prefetch = 0 : i64, scratch_operands = 0 : i64, tpu.core_type = #tpu.core_type<tc>, window_params = [{transform_indices = @transform_0, window_bounds = array<i64: 2, 8, 32>}, {pipeline_mode = #tpu.pipeline_mode<synchronous>, transform_indices = @transform_1, window_bounds = array<i64: 8, 32>}, {pipeline_mode = #tpu.pipeline_mode<synchronous>, transform_indices = @transform_2, window_bounds = array<i64: 2, 32, 96>}, {pipeline_mode = #tpu.pipeline_mode<synchronous>, transform_indices = @transform_3, window_bounds = array<i64: 2, 32, 32>}, {pipeline_mode = #tpu.pipeline_mode<synchronous>, transform_indices = @transform_4, window_bounds = array<i64: 2, 1, 32>}, {pipeline_mode = #tpu.pipeline_mode<synchronous>, transform_indices = @transform_5, window_bounds = array<i64: 2, 1, 32>}, {pipeline_mode = #tpu.pipeline_mode<synchronous>, transform_indices = @transform_6, window_bounds = array<i64: 2, 1, 32>}, {pipeline_mode = #tpu.pipeline_mode<synchronous>, transform_indices = @transform_7, window_bounds = array<i64: 2, 1, 32>}, {pipeline_mode = #tpu.pipeline_mode<synchronous>, transform_indices = @transform_8, window_bounds = array<i64: 2, 1, 32>}, {pipeline_mode = #tpu.pipeline_mode<synchronous>, transform_indices = @transform_9, window_bounds = array<i64: 2, 32, 128>}, {pipeline_mode = #tpu.pipeline_mode<synchronous>, transform_indices = @transform_10, window_bounds = array<i64: 2, 1, 128>}, {pipeline_mode = #tpu.pipeline_mode<synchronous>, transform_indices = @transform_11, window_bounds = array<i64: 2, 128, 32>}, {pipeline_mode = #tpu.pipeline_mode<synchronous>, transform_indices = @transform_12, window_bounds = array<i64: 2, 1, 32>}, {transform_indices = @transform_13, window_bounds = array<i64: 2, 8, 32>}]} {
    %c0_i32 = arith.constant 0 : i32
    %0 = arith.cmpi eq, %arg1, %c0_i32 : i32
    %1 = arith.extui %0 : i1 to i32
    %c0_i32_0 = arith.constant 0 : i32
    %2 = arith.cmpi ne, %1, %c0_i32_0 : i32
    scf.if %2 {
      %c0_46 = arith.constant 0 : index
      %c0_47 = arith.constant 0 : index
      %c0_48 = arith.constant 0 : index
      %125 = vector.load %arg2[%c0_46, %c0_47, %c0_48] : memref<2x8x32xbf16, #tpu.memory_space<vmem>>, vector<2x8x32xbf16>
      %126 = arith.extf %125 : vector<2x8x32xbf16> to vector<2x8x32xf32>
      %cst_49 = arith.constant 5.65685415 : f32
      %127 = vector.broadcast %cst_49 : f32 to vector<2x8x32xf32>
      %128 = arith.mulf %126, %127 : vector<2x8x32xf32>
      %c0_50 = arith.constant 0 : index
      %c0_51 = arith.constant 0 : index
      %129 = vector.load %arg3[%c0_50, %c0_51] : memref<8x32xbf16, #tpu.memory_space<vmem>>, vector<8x32xbf16>
      %130 = arith.extf %129 : vector<8x32xbf16> to vector<8x32xf32>
      %131 = vector.shape_cast %130 : vector<8x32xf32> to vector<1x8x32xf32>
      %132 = vector.broadcast %131 : vector<1x8x32xf32> to vector<2x8x32xf32>
      %133 = arith.addf %128, %132 : vector<2x8x32xf32>
      %c0_52 = arith.constant 0 : index
      %c0_53 = arith.constant 0 : index
      %c0_54 = arith.constant 0 : index
      %134 = vector.load %arg15[%c0_52, %c0_53, %c0_54] : memref<2x8x32xf32, #tpu.memory_space<vmem>>, vector<2x8x32xf32>
      tpu.vector_store %arg15[%c0_52, %c0_53, %c0_54], %133 {strides = array<i32>} : memref<2x8x32xf32, #tpu.memory_space<vmem>>, vector<2x8x32xf32>,
    } else {
    }
    %c0 = arith.constant 0 : index
    %c0_1 = arith.constant 0 : index
    %c0_2 = arith.constant 0 : index
    %3 = vector.load %arg15[%c0, %c0_1, %c0_2] : memref<2x8x32xf32, #tpu.memory_space<vmem>>, vector<2x8x32xf32>
    %4 = vector.shape_cast %3 : vector<2x8x32xf32> to vector<16x32xf32>
    %5 = arith.truncf %4 : vector<16x32xf32> to vector<16x32xbf16>
    %6 = arith.index_cast %arg1 : i32 to index
    %c0_3 = arith.constant 0 : index
    %c0_4 = arith.constant 0 : index
    %7 = vector.load %arg4[%6, %c0_3, %c0_4] : memref<2x32x96xbf16, #tpu.memory_space<vmem>>, vector<1x32x96xbf16>
    %8 = vector.shape_cast %7 : vector<1x32x96xbf16> to vector<32x96xbf16>
    %cst = arith.constant dense<0.000000e+00> : vector<16x96xf32>
    %9 = tpu.matmul %5, %8, %cst {dimension_numbers = #tpu.dot_dimension_numbers<[1], [0], [0], [1], [0, 0, 1, 1], [], []>} : vector<16x32xbf16>, vector<32x96xbf16>, vector<16x96xf32> -> vector<16x96xf32>
    %10 = vector.extract_strided_slice %9 {offsets = [0, 0], sizes = [16, 32], strides = [1, 1]} : vector<16x96xf32> to vector<16x32xf32>
    %11 = vector.shape_cast %10 : vector<16x32xf32> to vector<2x8x32xf32>
    %12 = arith.truncf %11 : vector<2x8x32xf32> to vector<2x8x32xbf16>
    %13 = vector.extract_strided_slice %9 {offsets = [0, 32], sizes = [16, 32], strides = [1, 1]} : vector<16x96xf32> to vector<16x32xf32>
    %14 = vector.shape_cast %13 : vector<16x32xf32> to vector<2x8x32xf32>
    %15 = arith.truncf %14 : vector<2x8x32xf32> to vector<2x8x32xbf16>
    %16 = vector.extract_strided_slice %9 {offsets = [0, 64], sizes = [16, 32], strides = [1, 1]} : vector<16x96xf32> to vector<16x32xf32>
    %17 = vector.shape_cast %16 : vector<16x32xf32> to vector<2x8x32xf32>
    %18 = arith.truncf %17 : vector<2x8x32xf32> to vector<2x8x32xbf16>
    "tpu.trace_start"() <{level = 10 : i32, message = "bqd,bkd->bqk"}> : () -> ()
    %cst_5 = arith.constant dense<0.000000e+00> : vector<2x8x8xf32>
    %19 = tpu.matmul %12, %15, %cst_5 {dimension_numbers = #tpu.dot_dimension_numbers<[2], [2], [1], [1], [0, 0, 0, 1, 1, 1], [0], [0]>} : vector<2x8x32xbf16>, vector<2x8x32xbf16>, vector<2x8x8xf32> -> vector<2x8x8xf32>
    "tpu.trace_stop"() : () -> ()
    %cst_6 = arith.constant dense<0xFF800000> : vector<2x8xf32>
    %20 = vector.multi_reduction <maximumf>, %19, %cst_6 [2] : vector<2x8x8xf32> to vector<2x8xf32>
    %21 = vector.shape_cast %20 : vector<2x8xf32> to vector<2x8x1xf32>
    %22 = vector.broadcast %21 : vector<2x8x1xf32> to vector<2x8x8xf32>
    %23 = arith.subf %19, %22 : vector<2x8x8xf32>
    %24 = math.exp %23 : vector<2x8x8xf32>
    %cst_7 = arith.constant dense<0.000000e+00> : vector<2x8xf32>
    %25 = vector.multi_reduction <add>, %24, %cst_7 [2] : vector<2x8x8xf32> to vector<2x8xf32>
    %26 = vector.shape_cast %25 : vector<2x8xf32> to vector<2x8x1xf32>
    %27 = arith.truncf %24 : vector<2x8x8xf32> to vector<2x8x8xbf16>
    "tpu.trace_start"() <{level = 10 : i32, message = "bqk,bkd->bqd"}> : () -> ()
    %cst_8 = arith.constant dense<0.000000e+00> : vector<2x8x32xf32>
    %28 = tpu.matmul %27, %18, %cst_8 {dimension_numbers = #tpu.dot_dimension_numbers<[2], [1], [1], [2], [0, 0, 0, 1, 1, 2], [0], [0]>} : vector<2x8x8xbf16>, vector<2x8x32xbf16>, vector<2x8x32xf32> -> vector<2x8x32xf32>
    "tpu.trace_stop"() : () -> ()
    %29 = tpu.reciprocal %26 {approx = true} : vector<2x8x1xf32> -> vector<2x8x1xf32>
    %30 = vector.broadcast %29 : vector<2x8x1xf32> to vector<2x8x32xf32>
    %31 = arith.mulf %28, %30 : vector<2x8x32xf32>
    %32 = vector.shape_cast %31 : vector<2x8x32xf32> to vector<16x32xf32>
    %33 = arith.truncf %32 : vector<16x32xf32> to vector<16x32xbf16>
    %34 = arith.index_cast %arg1 : i32 to index
    %c0_9 = arith.constant 0 : index
    %c0_10 = arith.constant 0 : index
    %35 = vector.load %arg5[%34, %c0_9, %c0_10] : memref<2x32x32xbf16, #tpu.memory_space<vmem>>, vector<1x32x32xbf16>
    %36 = vector.shape_cast %35 : vector<1x32x32xbf16> to vector<32x32xbf16>
    %cst_11 = arith.constant dense<0.000000e+00> : vector<16x32xf32>
    %37 = tpu.matmul %33, %36, %cst_11 {dimension_numbers = #tpu.dot_dimension_numbers<[1], [0], [0], [1], [0, 0, 1, 1], [], []>} : vector<16x32xbf16>, vector<32x32xbf16>, vector<16x32xf32> -> vector<16x32xf32>
    %38 = arith.index_cast %arg1 : i32 to index
    %c0_12 = arith.constant 0 : index
    %c0_13 = arith.constant 0 : index
    %39 = vector.load %arg6[%38, %c0_12, %c0_13] : memref<2x1x32xf32, #tpu.memory_space<vmem>>, vector<1x1x32xf32>
    %40 = vector.shape_cast %39 : vector<1x1x32xf32> to vector<1x32xf32>
    %41 = vector.broadcast %40 : vector<1x32xf32> to vector<16x32xf32>
    %42 = arith.addf %37, %41 : vector<16x32xf32>
    %43 = arith.addf %42, %4 : vector<16x32xf32>
    %44 = arith.index_cast %arg1 : i32 to index
    %c0_14 = arith.constant 0 : index
    %c0_15 = arith.constant 0 : index
    %45 = vector.load %arg7[%44, %c0_14, %c0_15] : memref<2x1x32xf32, #tpu.memory_space<vmem>>, vector<1x1x32xf32>
    %46 = vector.shape_cast %45 : vector<1x1x32xf32> to vector<1x32xf32>
    %47 = arith.index_cast %arg1 : i32 to index
    %c0_16 = arith.constant 0 : index
    %c0_17 = arith.constant 0 : index
    %48 = vector.load %arg8[%47, %c0_16, %c0_17] : memref<2x1x32xf32, #tpu.memory_space<vmem>>, vector<1x1x32xf32>
    %49 = vector.shape_cast %48 : vector<1x1x32xf32> to vector<1x32xf32>
    %cst_18 = arith.constant dense<0.000000e+00> : vector<16xf32>
    %50 = vector.multi_reduction <add>, %43, %cst_18 [1] : vector<16x32xf32> to vector<16xf32>
    %51 = vector.shape_cast %50 : vector<16xf32> to vector<16x1xf32>
    %cst_19 = arith.constant 3.200000e+01 : f32
    %52 = vector.broadcast %cst_19 : f32 to vector<16x1xf32>
    %53 = arith.divf %51, %52 : vector<16x1xf32>
    %54 = vector.broadcast %53 : vector<16x1xf32> to vector<16x32xf32>
    %55 = arith.subf %43, %54 : vector<16x32xf32>
    %56 = arith.mulf %55, %55 : vector<16x32xf32>
    %cst_20 = arith.constant dense<0.000000e+00> : vector<16xf32>
    %57 = vector.multi_reduction <add>, %56, %cst_20 [1] : vector<16x32xf32> to vector<16xf32>
    %58 = vector.shape_cast %57 : vector<16xf32> to vector<16x1xf32>
    %cst_21 = arith.constant 3.200000e+01 : f32
    %59 = vector.broadcast %cst_21 : f32 to vector<16x1xf32>
    %60 = arith.divf %58, %59 : vector<16x1xf32>
    %61 = vector.broadcast %53 : vector<16x1xf32> to vector<16x32xf32>
    %62 = arith.subf %43, %61 : vector<16x32xf32>
    %cst_22 = arith.constant 9.99999974E-6 : f32
    %63 = vector.broadcast %cst_22 : f32 to vector<16x1xf32>
    %64 = arith.addf %60, %63 : vector<16x1xf32>
    %65 = math.rsqrt %64 : vector<16x1xf32>
    %66 = vector.broadcast %65 : vector<16x1xf32> to vector<16x32xf32>
    %67 = arith.mulf %62, %66 : vector<16x32xf32>
    %68 = vector.broadcast %46 : vector<1x32xf32> to vector<16x32xf32>
    %69 = arith.mulf %67, %68 : vector<16x32xf32>
    %70 = vector.broadcast %49 : vector<1x32xf32> to vector<16x32xf32>
    %71 = arith.addf %69, %70 : vector<16x32xf32>
    %72 = arith.truncf %71 : vector<16x32xf32> to vector<16x32xbf16>
    %73 = arith.index_cast %arg1 : i32 to index
    %c0_23 = arith.constant 0 : index
    %c0_24 = arith.constant 0 : index
    %74 = vector.load %arg11[%73, %c0_23, %c0_24] : memref<2x32x128xbf16, #tpu.memory_space<vmem>>, vector<1x32x128xbf16>
    %75 = vector.shape_cast %74 : vector<1x32x128xbf16> to vector<32x128xbf16>
    %cst_25 = arith.constant dense<0.000000e+00> : vector<16x128xf32>
    %76 = tpu.matmul %72, %75, %cst_25 {dimension_numbers = #tpu.dot_dimension_numbers<[1], [0], [0], [1], [0, 0, 1, 1], [], []>} : vector<16x32xbf16>, vector<32x128xbf16>, vector<16x128xf32> -> vector<16x128xf32>
    %77 = arith.index_cast %arg1 : i32 to index
    %c0_26 = arith.constant 0 : index
    %c0_27 = arith.constant 0 : index
    %78 = vector.load %arg12[%77, %c0_26, %c0_27] : memref<2x1x128xf32, #tpu.memory_space<vmem>>, vector<1x1x128xf32>
    %79 = vector.shape_cast %78 : vector<1x1x128xf32> to vector<1x128xf32>
    %80 = vector.broadcast %79 : vector<1x128xf32> to vector<16x128xf32>
    %81 = arith.addf %76, %80 : vector<16x128xf32>
    %cst_28 = arith.constant 0.000000e+00 : f32
    %82 = vector.broadcast %cst_28 : f32 to vector<16x128xf32>
    %83 = arith.maximumf %81, %82 : vector<16x128xf32>
    %84 = arith.truncf %83 : vector<16x128xf32> to vector<16x128xbf16>
    %85 = arith.index_cast %arg1 : i32 to index
    %c0_29 = arith.constant 0 : index
    %c0_30 = arith.constant 0 : index
    %86 = vector.load %arg13[%85, %c0_29, %c0_30] : memref<2x128x32xbf16, #tpu.memory_space<vmem>>, vector<1x128x32xbf16>
    %87 = vector.shape_cast %86 : vector<1x128x32xbf16> to vector<128x32xbf16>
    %cst_31 = arith.constant dense<0.000000e+00> : vector<16x32xf32>
    %88 = tpu.matmul %84, %87, %cst_31 {dimension_numbers = #tpu.dot_dimension_numbers<[1], [0], [0], [1], [0, 0, 1, 1], [], []>} : vector<16x128xbf16>, vector<128x32xbf16>, vector<16x32xf32> -> vector<16x32xf32>
    %89 = arith.index_cast %arg1 : i32 to index
    %c0_32 = arith.constant 0 : index
    %c0_33 = arith.constant 0 : index
    %90 = vector.load %arg14[%89, %c0_32, %c0_33] : memref<2x1x32xf32, #tpu.memory_space<vmem>>, vector<1x1x32xf32>
    %91 = vector.shape_cast %90 : vector<1x1x32xf32> to vector<1x32xf32>
    %92 = vector.broadcast %91 : vector<1x32xf32> to vector<16x32xf32>
    %93 = arith.addf %88, %92 : vector<16x32xf32>
    %94 = arith.addf %93, %71 : vector<16x32xf32>
    %95 = arith.index_cast %arg1 : i32 to index
    %c0_34 = arith.constant 0 : index
    %c0_35 = arith.constant 0 : index
    %96 = vector.load %arg9[%95, %c0_34, %c0_35] : memref<2x1x32xf32, #tpu.memory_space<vmem>>, vector<1x1x32xf32>
    %97 = vector.shape_cast %96 : vector<1x1x32xf32> to vector<1x32xf32>
    %98 = arith.index_cast %arg1 : i32 to index
    %c0_36 = arith.constant 0 : index
    %c0_37 = arith.constant 0 : index
    %99 = vector.load %arg10[%98, %c0_36, %c0_37] : memref<2x1x32xf32, #tpu.memory_space<vmem>>, vector<1x1x32xf32>
    %100 = vector.shape_cast %99 : vector<1x1x32xf32> to vector<1x32xf32>
    %cst_38 = arith.constant dense<0.000000e+00> : vector<16xf32>
    %101 = vector.multi_reduction <add>, %94, %cst_38 [1] : vector<16x32xf32> to vector<16xf32>
    %102 = vector.shape_cast %101 : vector<16xf32> to vector<16x1xf32>
    %cst_39 = arith.constant 3.200000e+01 : f32
    %103 = vector.broadcast %cst_39 : f32 to vector<16x1xf32>
    %104 = arith.divf %102, %103 : vector<16x1xf32>
    %105 = vector.broadcast %104 : vector<16x1xf32> to vector<16x32xf32>
    %106 = arith.subf %94, %105 : vector<16x32xf32>
    %107 = arith.mulf %106, %106 : vector<16x32xf32>
    %cst_40 = arith.constant dense<0.000000e+00> : vector<16xf32>
    %108 = vector.multi_reduction <add>, %107, %cst_40 [1] : vector<16x32xf32> to vector<16xf32>
    %109 = vector.shape_cast %108 : vector<16xf32> to vector<16x1xf32>
    %cst_41 = arith.constant 3.200000e+01 : f32
    %110 = vector.broadcast %cst_41 : f32 to vector<16x1xf32>
    %111 = arith.divf %109, %110 : vector<16x1xf32>
    %112 = vector.broadcast %104 : vector<16x1xf32> to vector<16x32xf32>
    %113 = arith.subf %94, %112 : vector<16x32xf32>
    %cst_42 = arith.constant 9.99999974E-6 : f32
    %114 = vector.broadcast %cst_42 : f32 to vector<16x1xf32>
    %115 = arith.addf %111, %114 : vector<16x1xf32>
    %116 = math.rsqrt %115 : vector<16x1xf32>
    %117 = vector.broadcast %116 : vector<16x1xf32> to vector<16x32xf32>
    %118 = arith.mulf %113, %117 : vector<16x32xf32>
    %119 = vector.broadcast %97 : vector<1x32xf32> to vector<16x32xf32>
    %120 = arith.mulf %118, %119 : vector<16x32xf32>
    %121 = vector.broadcast %100 : vector<1x32xf32> to vector<16x32xf32>
    %122 = arith.addf %120, %121 : vector<16x32xf32>
    %123 = vector.shape_cast %122 : vector<16x32xf32> to vector<2x8x32xf32>
    %c0_43 = arith.constant 0 : index
    %c0_44 = arith.constant 0 : index
    %c0_45 = arith.constant 0 : index
    %124 = vector.load %arg15[%c0_43, %c0_44, %c0_45] : memref<2x8x32xf32, #tpu.memory_space<vmem>>, vector<2x8x32xf32>
    tpu.vector_store %arg15[%c0_43, %c0_44, %c0_45], %123 {strides = array<i32>} : memref<2x8x32xf32, #tpu.memory_space<vmem>>, vector<2x8x32xf32>,
    return
  }
  func.func @transform_0(%arg0: i32, %arg1: i32) -> (i32, i32, i32) {
    %c0_i32 = arith.constant 0 : i32
    %c0_i32_0 = arith.constant 0 : i32
    %c0_i32_1 = arith.constant 0 : i32
    return %arg0, %c0_i32, %c0_i32_0 : i32, i32, i32
  }
  func.func @transform_1(%arg0: i32, %arg1: i32) -> (i32, i32) {
    %c0_i32 = arith.constant 0 : i32
    %c0_i32_0 = arith.constant 0 : i32
    %c0_i32_1 = arith.constant 0 : i32
    return %c0_i32, %c0_i32_0 : i32, i32
  }
  func.func @transform_2(%arg0: i32, %arg1: i32) -> (i32, i32, i32) {
    %c0_i32 = arith.constant 0 : i32
    %c0_i32_0 = arith.constant 0 : i32
    %c0_i32_1 = arith.constant 0 : i32
    %c0_i32_2 = arith.constant 0 : i32
    return %c0_i32, %c0_i32_0, %c0_i32_1 : i32, i32, i32
  }
  func.func @transform_3(%arg0: i32, %arg1: i32) -> (i32, i32, i32) {
    %c0_i32 = arith.constant 0 : i32
    %c0_i32_0 = arith.constant 0 : i32
    %c0_i32_1 = arith.constant 0 : i32
    %c0_i32_2 = arith.constant 0 : i32
    return %c0_i32, %c0_i32_0, %c0_i32_1 : i32, i32, i32
  }
  func.func @transform_4(%arg0: i32, %arg1: i32) -> (i32, i32, i32) {
    %c0_i32 = arith.constant 0 : i32
    %c0_i32_0 = arith.constant 0 : i32
    %c0_i32_1 = arith.constant 0 : i32
    %c0_i32_2 = arith.constant 0 : i32
    return %c0_i32, %c0_i32_0, %c0_i32_1 : i32, i32, i32
  }
  func.func @transform_5(%arg0: i32, %arg1: i32) -> (i32, i32, i32) {
    %c0_i32 = arith.constant 0 : i32
    %c0_i32_0 = arith.constant 0 : i32
    %c0_i32_1 = arith.constant 0 : i32
    %c0_i32_2 = arith.constant 0 : i32
    return %c0_i32, %c0_i32_0, %c0_i32_1 : i32, i32, i32
  }
  func.func @transform_6(%arg0: i32, %arg1: i32) -> (i32, i32, i32) {
    %c0_i32 = arith.constant 0 : i32
    %c0_i32_0 = arith.constant 0 : i32
    %c0_i32_1 = arith.constant 0 : i32
    %c0_i32_2 = arith.constant 0 : i32
    return %c0_i32, %c0_i32_0, %c0_i32_1 : i32, i32, i32
  }
  func.func @transform_7(%arg0: i32, %arg1: i32) -> (i32, i32, i32) {
    %c0_i32 = arith.constant 0 : i32
    %c0_i32_0 = arith.constant 0 : i32
    %c0_i32_1 = arith.constant 0 : i32
    %c0_i32_2 = arith.constant 0 : i32
    return %c0_i32, %c0_i32_0, %c0_i32_1 : i32, i32, i32
  }
  func.func @transform_8(%arg0: i32, %arg1: i32) -> (i32, i32, i32) {
    %c0_i32 = arith.constant 0 : i32
    %c0_i32_0 = arith.constant 0 : i32
    %c0_i32_1 = arith.constant 0 : i32
    %c0_i32_2 = arith.constant 0 : i32
    return %c0_i32, %c0_i32_0, %c0_i32_1 : i32, i32, i32
  }
  func.func @transform_9(%arg0: i32, %arg1: i32) -> (i32, i32, i32) {
    %c0_i32 = arith.constant 0 : i32
    %c0_i32_0 = arith.constant 0 : i32
    %c0_i32_1 = arith.constant 0 : i32
    %c0_i32_2 = arith.constant 0 : i32
    return %c0_i32, %c0_i32_0, %c0_i32_1 : i32, i32, i32
  }
  func.func @transform_10(%arg0: i32, %arg1: i32) -> (i32, i32, i32) {
    %c0_i32 = arith.constant 0 : i32
    %c0_i32_0 = arith.constant 0 : i32
    %c0_i32_1 = arith.constant 0 : i32
    %c0_i32_2 = arith.constant 0 : i32
    return %c0_i32, %c0_i32_0, %c0_i32_1 : i32, i32, i32
  }
  func.func @transform_11(%arg0: i32, %arg1: i32) -> (i32, i32, i32) {
    %c0_i32 = arith.constant 0 : i32
    %c0_i32_0 = arith.constant 0 : i32
    %c0_i32_1 = arith.constant 0 : i32
    %c0_i32_2 = arith.constant 0 : i32
    return %c0_i32, %c0_i32_0, %c0_i32_1 : i32, i32, i32
  }
  func.func @transform_12(%arg0: i32, %arg1: i32) -> (i32, i32, i32) {
    %c0_i32 = arith.constant 0 : i32
    %c0_i32_0 = arith.constant 0 : i32
    %c0_i32_1 = arith.constant 0 : i32
    %c0_i32_2 = arith.constant 0 : i32
    return %c0_i32, %c0_i32_0, %c0_i32_1 : i32, i32, i32
  }
  func.func @transform_13(%arg0: i32, %arg1: i32) -> (i32, i32, i32) {
    %c0_i32 = arith.constant 0 : i32
    %c0_i32_0 = arith.constant 0 : i32
    %c0_i32_1 = arith.constant 0 : i32
    return %arg0, %c0_i32, %c0_i32_0 : i32, i32, i32
  }
}

</mosaic_0001>

<bundles_post_ra>
// kernel: transformer_encoder.1
= control target key start
LH: loop header
LB: loop body
LE: loop exit
PB: predicated region body
PF: predicated region fallthrough
CT: control target
= control target key end

     0   :  { %18 = vsyncpa [#allocation3], 0  ;;  %s1535_s25 = smov 0   ;;  %s1537_s26 = smov 0   ;;  %s1718_s0 = inlined_call_operand.vmem [shape: bf16[2,8,32], index: 0, kind: input, shape index: {}]   ;;  %s1719_s1 = inlined_call_operand.vmem [shape: bf16[8,32], index: 1, kind: input, shape index: {}]   ;;  %s1720_s2 = inlined_call_operand.vmem [shape: bf16[2,32,96], index: 2, kind: input, shape index: {}]   ;;  %s1721_s3 = inlined_call_operand.vmem [shape: bf16[2,32,32], index: 3, kind: input, shape index: {}]   ;;  %s1722_s4 = inlined_call_operand.vmem [shape: f32[2,1,32], index: 4, kind: input, shape index: {}]   ;;  %s1723_s5 = inlined_call_operand.vmem [shape: f32[2,1,32], index: 5, kind: input, shape index: {}]   ;;  %s1724_s6 = inlined_call_operand.vmem [shape: f32[2,1,32], index: 6, kind: input, shape index: {}]   ;;  %s1725_s7 = inlined_call_operand.vmem [shape: f32[2,1,32], index: 7, kind: input, shape index: {}]   ;;  %s1726_s8 = inlined_call_operand.vmem [shape: f32[2,1,32], index: 8, kind: input, shape index: {}]   ;;  %s1727_s9 = inlined_call_operand.vmem [shape: bf16[2,32,128], index: 9, kind: input, shape index: {}]   ;;  %s1728_s10 = inlined_call_operand.vmem [shape: f32[2,1,128], index: 10, kind: input, shape index: {}]   ;;  %s1729_s11 = inlined_call_operand.vmem [shape: bf16[2,128,32], index: 11, kind: input, shape index: {}]   ;;  %s1730_s12 = inlined_call_operand.vmem [shape: f32[2,1,32], index: 12, kind: input, shape index: {}]   ;;  %s1731_s13 = inlined_call_operand.hbm [shape: f32[2,8,32], index: 13, kind: output, shape index: {}]  }
   0x1   :  { %s1539_s27 = smov 0  }
   0x2 LB: > { %s1194_s28 = sadd.s32 4294967295, %s1456_s27   ;;  %s33_s29 = sadd.s32 1, %s1452_s26  ;;  %s1456_s27 = sphi %s1539_s27, %s24_s27   ;;  %s1452_s26 = sphi %s1537_s26, %s1734_s26   ;;  %s1448_s25 = sphi %s1535_s25, %s1733_s25  }
   0x3   : > { %p34_p0 = scmp.ge.s32.totalorder %s33_s29, 2  ;;  %p1197_p1 = scmp.ge.s32.totalorder %s1456_s27, 1 }
   0x4   : > { %p401_p2 = scmp.lt.s32.totalorder %s1456_s27, 3 }
   0x5   : > { %s1736_s29 = smov (%p34_p0, %s33_s29), 0 }
   0x6   : > { %p402_p3 = pnand %p1197_p1, %p401_p2 }
   0x7   : > { %p1198_p4 = scmp.ne.s32.totalorder (!%p402_p3), %s1448_s25, 0 }
   0x8   : > { %405 = sbr.rel (%p402_p3) target bundleno = 2140 (0x85c), region = 72 }
   0xd   : > { %451 = sbr.rel (%p1198_p4) target bundleno = 26 (0x1a), region = 76 }
  0x12   : > { %v1242_v0 = vld [vmem:[%s1718_s0] sm:$0xff]   ;;  %vm462_vm0 = vcmask 261120  }
  0x13   : > { %v458_v1 = vld [vmem:[%s1719_s1] sm:$0xf]  ;;  %v1243_v2 = vunpack.c.l.bf16 %v1242_v0  ;;  %v1244_v4 = vunpack.c.h.bf16 %v1242_v0 }
  0x14   : > { %v459_v3 = vunpack.c.l.bf16 %v458_v1 }
  0x15   : > { %v456_v5 = vmul.f32 5.656854, %v1243_v2  ;;  %v457_v6 = vmul.f32 5.656854, %v1244_v4 }
  0x17   : > { %v460_v7 = vadd.f32 %v459_v3, %v456_v5  ;;  %v461_v8 = vadd.f32 %v459_v3, %v457_v6 }
  0x19   : > { %463 = vst.msk [vmem:[#allocation2] sm:$0xff] %vm462_vm0, %v460_v7  ;;  %464 = vst.msk [vmem:[#allocation2 + $0x8] sm:$0xff] %vm462_vm0, %v461_v8 }
  0x1a PF: > { %s1237_s17 = sshll.u32 %s1448_s25, 4  ;;  %v1458_v9 = vmov 0.0   ;;  %vm1459_vm1 = vmmov 0   ;;  %vm487_vm2 = vcmask 261120   ;;  %s1460_s15 = smov 96   ;;  %vm658_vm3 = vcmask 1043456  }
  0x1b   : > { %1271 = vmatprep.subr.bf16.mxu0 %v1458_v9  ;;  %s470_s20 = scalar_lea.vmem %s1720_s2, %s1237_s17  ;;  %1275 = vmatprep.mubr.msk.bf16.mxu0 %vm1459_vm1, %v1458_v9  ;;  %s1580_s23 = scalar_lea.vmem %s1721_s3, %s1237_s17  ;;  %vm632_vm4 = vcmask 64512  }
  0x1c   : > { %v1376_v10 = vld [vmem:[%s470_s20 + $0x8] sm:$0xff]   ;;  %1291 = vmatprep.subr.bf16.mxu1 %v1458_v9  ;;  %1293 = vmatprep.mubr.msk.bf16.mxu1 %vm1459_vm1, %v1458_v9  ;;  %v1377_v13 = vld [vmem:[%s470_s20] sm:$0xff]   ;;  %s1585_s14 = scalar_lea.vmem %s1727_s9, %s1237_s17  ;;  %s1461_s16 = smov 64  }
  0x1d   : > { %1272 = vmatpush3.bf16.msra.mxu0 %v1376_v10  ;;  %v1378_v51 = vld [vmem:[%s1580_s23 + $0x8] sm:$0xff]   ;;  %v1379_v52 = vld [vmem:[%s1580_s23] sm:$0xff]   ;;  %s761_s19 = scalar_lea.vmem %s1722_s4, %s1448_s25  ;;  %s1240_s20 = sshll.u32 %s1448_s25, 6 }
  0x1e   : > { %1273 = vmatprep.subr.bf16.mxu0 %v1458_v9  ;;  %v1209_v4 = vld [vmem:[%s761_s19] ss:$0 sm:$0xff]  ;;  %s1644_s23 = scalar_lea.vmem %s1729_s11, %s1240_s20  ;;  %s829_s17 = scalar_lea.vmem %s1724_s6, %s1448_s25 }
  0x1f   : > { %s881_s20 = scalar_lea.vmem %s1728_s10, %s1448_s25  ;;  %s1462_s18 = smov [#allocation2]  }
  0x20   : > { %v1570_v11 = vld [vmem:[#allocation2] sm:$0xff]  ;;  %v1572_v12 = vld [vmem:[#allocation2 + $0x8] sm:$0xff]  ;;  %s1123_s19 = sshll.u32 %s1462_s18, 4  ;;  %p1693_p5 = scmp.eq.s32.totalorder %s1194_s28, 1  ;;  %s1124_s19 = int_to_ptr.vmem [resolvable:$true] %s1123_s19 }
  0x21   : > { %v467_v14 = vpack.c.bf16 %v1572_v12, %v1570_v11  ;;  %1274 = vmatpush3.bf16.msra.mxu0 %v1377_v13  ;;  %p1413_p9 = scmp.lt.s32.totalorder %s1124_s19, %s1124_s19 }
  0x22   : > { %1279 = vmatprep.subr.bf16.mxu0 %v1458_v9 }
  0x24   : > { %1276 = vmatmul.mubr.msk.bf16.vlgmr.msra.gmra.mxu0 %vm487_vm2, %v467_v14 }
  0x25   : > { %1281 = vmatprep.mubr.msk.bf16.mxu0 %vm1459_vm1, %v1458_v9 }
  0xe4   : > { %v525_v15 = vpop.f32.mrf.mxu0 }
  0xe5   : > { %v532_v16 = vpack.c.bf16 %v525_v15, %v525_v15 }
  0xe6   : > { %v1277_v17 = vpop.f32.mrf.mxu0 }
  0xe7   : > { %535 = vrot.lane.b32.xlu0 %v532_v16, %s1460_s15 }
  0xe8   : > { %v528_v18 = vpop.f32.mrf.mxu0 }
  0xe9   : > { %v533_v19 = vpack.c.bf16 %v528_v18, %v528_v18 }
  0xea   : > { %v1278_v20 = vpop.f32.mrf.mxu0 }
  0xeb   : > { %584 = vrot.lane.b32.xlu0 %v533_v19, %s1460_s15 }
  0xef   : > { %653 = vrot.lane.b32.xlu0 %v532_v16, %s1461_s16 }
 0x159   : > { %v536_v21 = vpop.permute.xlu0 %535 }
 0x15a   : > { %v541_v22 = vsel %vm487_vm2, %v536_v21, 0 }
 0x15b   : > { %1280 = vmatpush3.bf16.xpose.msra.mxu0 %v541_v22 }
 0x15c   : > { %1285 = vmatprep.subr.bf16.mxu0 %v1458_v9 }
 0x15d   : > { %v585_v23 = vpop.permute.xlu0 %584 }
 0x15e   : > { %v590_v25 = vsel %vm487_vm2, %v585_v23, 0 }
 0x161   : > { %v654_v24 = vpop.permute.xlu0 %653 }
 0x162   : > { %1282 = vmatmul.mubr.msk.bf16.vlgmr.msra.gmra.mxu0 %vm487_vm2, %v532_v16  ;;  %v660_v26 = vsel %vm658_vm3, %v654_v24, 0 }
 0x163   : > { %1286 = vmatpush3.bf16.xpose.msra.mxu0 %v590_v25  ;;  %1292 = vmatpush3.bf16.msra.mxu1 %v660_v26 }
 0x164   : > { %1287 = vmatprep.mubr.msk.bf16.mxu0 %vm1459_vm1, %v1458_v9  ;;  %1297 = vmatprep.subr.bf16.mxu0 %v1458_v9 }
 0x165   : > { %1303 = vmatprep.subr.bf16.mxu1 %v1458_v9 }
 0x16a   : > { %1288 = vmatmul.mubr.msk.bf16.vlgmr.msra.gmra.mxu0 %vm487_vm2, %v533_v19 }
 0x16b   : > { %1299 = vmatprep.mubr.msk.bf16.mxu0 %vm1459_vm1, %v1458_v9 }
 0x222   : > { %v577_v27 = vpop.f32.mrf.mxu0 }
 0x223   : > { %v633_v28 = vsel %vm632_vm4, %v577_v27, -inf }
 0x224   : > { %634 = vmax.xlane.f32.xlu1 %v633_v28  ;;  %v1283_v29 = vpop.f32.mrf.mxu0  ;;  %v1382_v28 = vld [vmem:[%s1644_s23 + $0x38] sm:$0xff]  }
 0x225   : > { %v1383_v29 = vld [vmem:[%s1644_s23 + $0x30] sm:$0xff]  }
 0x226   : > { %v580_v30 = vpop.f32.mrf.mxu0 }
 0x227   : > { %v1384_v30 = vld [vmem:[%s1644_s23 + $0x28] sm:$0xff]  }
 0x228   : > { %v1284_v31 = vpop.f32.mrf.mxu0 }
 0x229   : > { %v1385_v31 = vld [vmem:[%s1644_s23 + $0x20] sm:$0xff]  }
 0x22a   : > { %v626_v32 = vpop.f32.mrf.mxu0 }
 0x22b   : > { %v636_v33 = vsel %vm632_vm4, %v626_v32, -inf }
 0x22c   : > { %637 = vmax.xlane.f32.xlu1 %v636_v33  ;;  %v1289_v34 = vpop.f32.mrf.mxu0 }
 0x22e   : > { %v629_v35 = vpop.f32.mrf.mxu0 }
 0x230   : > { %v1290_v36 = vpop.f32.mrf.mxu0 }
 0x23d   : > { %702 = vrot.lane.b32.xlu1 %v533_v19, %s1461_s16 }
 0x2ad   : > { %v635_v37 = vpop.xlane.xlu1 %634 }
 0x2ae   : > { %v639_v38 = vsub.f32 %v577_v27, %v635_v37  ;;  %v1381_v27 = vld [vmem:[%s1585_s14] sm:$0xff]  }
 0x2b0   : > { %v641_v39 = vmul.f32 1.442695, %v639_v38 }
 0x2b2   : > { %1390 = vpow2.f32 %v641_v39 }
 0x2b5   : > { %v638_v40 = vpop.xlane.xlu1 %637 }
 0x2b6   : > { %v640_v41 = vsub.f32 %v626_v32, %v638_v40  ;;  %v1386_v32 = vld [vmem:[%s1644_s23 + $0x18] sm:$0xff]  }
 0x2b8   : > { %v643_v42 = vmul.f32 1.442695, %v640_v41 }
 0x2b9   : > { %v703_v43 = vpop.permute.xlu1 %702 }
 0x2ba   : > { %1392 = vpow2.f32 %v643_v42  ;;  %v708_v44 = vsel %vm658_vm3, %v703_v43, 0 }
 0x2bb   : > { %1298 = vmatpush3.bf16.msra.mxu0 %v708_v44 }
 0x2bc   : > { %1311 = vmatprep.subr.bf16.mxu0 %v1458_v9 }
 0x2bf   : > { %v1391_v45 = vpop.eup %1390 }
 0x2c0   : > { %v645_v46 = vsel %vm632_vm4, %v1391_v45, 0.0  ;;  %v651_v47 = vpack.c.bf16 %v1391_v45, %v1391_v45  ;;  %v1214_v45 = vld [vmem:[%s829_s17] ss:$0 sm:$0xff]  ;;  %s1068_s17 = scalar_lea.vmem %s1726_s8, %s1448_s25 }
 0x2c1   : > { %646 = vadd.xlane.f32.xlu0 %v645_v46 }
 0x2c2   : > { %1294 = vmatmul.mubr.msk.bf16.vlgmr.msra.gmra.mxu1 %vm632_vm4, %v651_v47 }
 0x2c3   : > { %1307 = vmatprep.mubr.msk.bf16.mxu1 %vm1459_vm1, %v1458_v9  ;;  %1304 = vmatpush3.bf16.msra.mxu1 %v1378_v51  ;;  %v1388_v51 = vld [vmem:[%s1644_s23 + $0x8] sm:$0xff]  }
 0x2c4   : > { %1305 = vmatprep.subr.bf16.mxu1 %v1458_v9 }
 0x2c7   : > { %v1393_v48 = vpop.eup %1392  ;;  %1306 = vmatpush3.bf16.msra.mxu1 %v1379_v52  ;;  %v1389_v52 = vld [vmem:[%s1644_s23] sm:$0xff]  }
 0x2c8   : > { %v648_v49 = vsel %vm632_vm4, %v1393_v48, 0.0  ;;  %v652_v50 = vpack.c.bf16 %v1393_v48, %v1393_v48  ;;  %1319 = vmatprep.subr.bf16.mxu1 %v1458_v9 }
 0x2c9   : > { %649 = vadd.xlane.f32.xlu1 %v648_v49 }
 0x2ca   : > { %1300 = vmatmul.mubr.msk.bf16.vlgmr.msra.gmra.mxu0 %vm632_vm4, %v652_v50  ;;  %v1387_v50 = vld [vmem:[%s1644_s23 + $0x10] sm:$0xff]   ;;  %s967_s23 = scalar_lea.vmem %s1730_s12, %s1448_s25 }
 0x2cb   : > { %1315 = vmatprep.mubr.msk.bf16.mxu0 %vm1459_vm1, %v1458_v9 }
 0x34a   : > { %v647_v53 = vpop.xlane.xlu0 %646 }
 0x34b   : > { %1394 = vrcp.f32 %v647_v53  ;;  %v1216_v53 = vld [vmem:[%s881_s20] ss:$0 sm:$0xff] }
 0x352   : > { %v650_v54 = vpop.xlane.xlu1 %649 }
 0x353   : > { %1396 = vrcp.f32 %v650_v54 }
 0x358   : > { %v1395_v59 = vpop.eup %1394 }
 0x360   : > { %v1397_v60 = vpop.eup %1396 }
 0x382   : > { %v696_v55 = vpop.f32.mrf.mxu1 }
 0x383   : > { %v752_v62 = vmul.f32 %v1395_v59, %v696_v55 }
 0x384   : > { %v1295_v56 = vpop.f32.mrf.mxu1 }
 0x386   : > { %v699_v57 = vpop.f32.mrf.mxu1 }
 0x388   : > { %v1296_v58 = vpop.f32.mrf.mxu1 }
 0x38a   : > { %v744_v61 = vpop.f32.mrf.mxu0 }
 0x38b   : > { %v753_v63 = vmul.f32 %v1397_v60, %v744_v61 }
 0x38c   : > { %v1301_v0 = vpop.f32.mrf.mxu0 }
 0x38d   : > { %v754_v1 = vpack.c.bf16 %v753_v63, %v752_v62 }
 0x38e   : > { %v747_v2 = vpop.f32.mrf.mxu0 }
 0x38f   : > { %1308 = vmatmul.mubr.msk.bf16.vlgmr.msra.gmra.mxu1 %vm487_vm2, %v754_v1 }
 0x390   : > { %v1302_v3 = vpop.f32.mrf.mxu0  ;;  %1335 = vmatprep.mubr.msk.bf16.mxu1 %vm1459_vm1, %v1458_v9  ;;  %1320 = vmatpush3.bf16.msra.mxu1 %v1382_v28 }
 0x391   : > { %1321 = vmatprep.subr.bf16.mxu1 %v1458_v9 }
 0x394   : > { %1322 = vmatpush3.bf16.msra.mxu1 %v1383_v29  ;;  %v1232_v29 = vld [vmem:[%s1068_s17] ss:$0 sm:$0xff] }
 0x395   : > { %1323 = vmatprep.subr.bf16.mxu1 %v1458_v9 }
 0x398   : > { %1324 = vmatpush3.bf16.msra.mxu1 %v1384_v30 }
 0x399   : > { %1325 = vmatprep.subr.bf16.mxu1 %v1458_v9 }
 0x39c   : > { %1326 = vmatpush3.bf16.msra.mxu1 %v1385_v31 }
 0x39d   : > { %1327 = vmatprep.subr.bf16.mxu1 %v1458_v9 }
 0x3a0   : > { %1328 = vmatpush3.bf16.msra.mxu1 %v1386_v32 }
 0x3a1   : > { %1329 = vmatprep.subr.bf16.mxu1 %v1458_v9 }
 0x3a4   : > { %1330 = vmatpush3.bf16.msra.mxu1 %v1387_v50 }
 0x3a5   : > { %1331 = vmatprep.subr.bf16.mxu1 %v1458_v9 }
 0x3a8   : > { %1332 = vmatpush3.bf16.msra.mxu1 %v1388_v51 }
 0x3a9   : > { %1333 = vmatprep.subr.bf16.mxu1 %v1458_v9 }
 0x3ac   : > { %1334 = vmatpush3.bf16.msra.mxu1 %v1389_v52 }
 0x44f   : > { %v818_v5 = vpop.f32.mrf.mxu1 }
 0x450   : > { %v819_v6 = vadd.f32 %v1209_v4, %v818_v5 }
 0x451   : > { %v1309_v7 = vpop.f32.mrf.mxu1 }
 0x452   : > { %v825_v8 = vadd.f32 %v819_v6, %v1570_v11 }
 0x453   : > { %v821_v10 = vpop.f32.mrf.mxu1 }
 0x454   : > { %v822_v13 = vadd.f32 %v1209_v4, %v821_v10  ;;  %v831_v14 = vsel %vm487_vm2, %v825_v8, 0.0 }
 0x455   : > { %832 = vadd.xlane.f32.xlu0 %v831_v14  ;;  %v1310_v15 = vpop.f32.mrf.mxu1 }
 0x456   : > { %v826_v16 = vadd.f32 %v822_v13, %v1572_v12  ;;  %v1380_v12 = vld [vmem:[%s1585_s14 + $0x8] sm:$0xff]   ;;  %s827_s14 = scalar_lea.vmem %s1723_s5, %s1448_s25 }
 0x457   : > { %1312 = vmatpush3.bf16.msra.mxu0 %v1380_v12  ;;  %v1213_v41 = vld [vmem:[%s827_s14] ss:$0 sm:$0xff]  ;;  %s1066_s14 = scalar_lea.vmem %s1725_s7, %s1448_s25  ;;  %s1406_s25 = scalar_lea.vmem %s1124_s19, 256 }
 0x458   : > { %v834_v17 = vsel %vm487_vm2, %v826_v16, 0.0  ;;  %1313 = vmatprep.subr.bf16.mxu0 %v1458_v9  ;;  %v1222_v9 = vld [vmem:[%s967_s23] ss:$0 sm:$0xff]  ;;  %p1407_p6 = scmp.ne.s32.totalorder %s1124_s19, %s1406_s25  ;;  %p1414_p10 = scmp.lt.s32.totalorder %s1406_s25, %s1406_s25 }
 0x459   : > { %835 = vadd.xlane.f32.xlu0 %v834_v17 }
 0x45a   : > { %p1408_p7 = pnand %p1407_p6, %p1693_p5  ;;  %p1415_p11 = por %p1414_p10, %p1413_p9 }
 0x45b   : > { %1314 = vmatpush3.bf16.msra.mxu0 %v1381_v27  ;;  %v1231_v27 = vld [vmem:[%s1066_s14] ss:$0 sm:$0xff] }
 0x45c   : > { %p1409_p8 = pneg %p1408_p7 }
 0x45e   : > { %p1416_p12 = pnand %p1415_p11, %p1409_p8 }
 0x4de   : > { %v833_v18 = vpop.xlane.xlu0 %832 }
 0x4df   : > { %v838_v19 = vmul.f32 0.03125, %v833_v18 }
 0x4e1   : > { %v840_v20 = vsub.f32 %v825_v8, %v838_v19 }
 0x4e2   : > { %v836_v21 = vpop.xlane.xlu0 %835 }
 0x4e3   : > { %v839_v22 = vmul.f32 0.03125, %v836_v21  ;;  %v842_v11 = vmul.f32 %v840_v20, %v840_v20 }
 0x4e5   : > { %v841_v23 = vsub.f32 %v826_v16, %v839_v22  ;;  %v844_v24 = vsel %vm487_vm2, %v842_v11, 0.0 }
 0x4e6   : > { %845 = vadd.xlane.f32.xlu0 %v844_v24 }
 0x4e7   : > { %v843_v25 = vmul.f32 %v841_v23, %v841_v23 }
 0x4e9   : > { %v847_v26 = vsel %vm487_vm2, %v843_v25, 0.0 }
 0x4ea   : > { %848 = vadd.xlane.f32.xlu0 %v847_v26 }
 0x56f   : > { %v846_v33 = vpop.xlane.xlu0 %845 }
 0x570   : > { %v850_v34 = vmul.f32 0.03125, %v846_v33 }
 0x572   : > { %v852_v35 = vadd.f32 1e-05, %v850_v34 }
 0x573   : > { %v849_v36 = vpop.xlane.xlu0 %848 }
 0x574   : > { %1398 = vrsqrt.f32 %v852_v35  ;;  %v851_v37 = vmul.f32 0.03125, %v849_v36 }
 0x576   : > { %v853_v38 = vadd.f32 1e-05, %v851_v37 }
 0x578   : > { %1400 = vrsqrt.f32 %v853_v38 }
 0x581   : > { %v1399_v39 = vpop.eup %1398 }
 0x582   : > { %v856_v40 = vmul.f32 %v1399_v39, %v840_v20 }
 0x584   : > { %v864_v44 = vmul.f32 %v1213_v41, %v856_v40 }
 0x585   : > { %v1401_v42 = vpop.eup %1400 }
 0x586   : > { %v857_v43 = vmul.f32 %v1401_v42, %v841_v23  ;;  %v872_v47 = vadd.f32 %v1214_v45, %v864_v44 }
 0x588   : > { %v865_v46 = vmul.f32 %v1213_v41, %v857_v43 }
 0x58a   : > { %v873_v48 = vadd.f32 %v1214_v45, %v865_v46 }
 0x58c   : > { %v874_v49 = vpack.c.bf16 %v873_v48, %v872_v47 }
 0x58e   : > { %1316 = vmatmul.mubr.msk.bf16.vlgmr.msra.gmra.mxu0 %vm487_vm2, %v874_v49 }
 0x64e   : > { %v938_v54 = vpop.f32.mrf.mxu0 }
 0x64f   : > { %v939_v56 = vadd.f32 %v1216_v53, %v938_v54 }
 0x650   : > { %v1317_v55 = vpop.f32.mrf.mxu0 }
 0x651   : > { %v945_v60 = vmax.f32 %v939_v56, 0.0 }
 0x652   : > { %v941_v57 = vpop.f32.mrf.mxu0 }
 0x653   : > { %v942_v58 = vadd.f32 %v1216_v53, %v941_v57 }
 0x654   : > { %v1318_v59 = vpop.f32.mrf.mxu0 }
 0x655   : > { %v946_v61 = vmax.f32 %v942_v58, 0.0 }
 0x657   : > { %v947_v62 = vpack.c.bf16 %v946_v61, %v945_v60 }
 0x659   : > { %1336 = vmatmul.mubr.bf16.vlgmr.msra.gmra.mxu1 %v947_v62 }
 0x719   : > { %v1057_v63 = vpop.f32.mrf.mxu1 }
 0x71a   : > { %v1058_v0 = vadd.f32 %v1222_v9, %v1057_v63 }
 0x71b   : > { %v1337_v1 = vpop.f32.mrf.mxu1 }
 0x71c   : > { %v1064_v2 = vadd.f32 %v1058_v0, %v872_v47 }
 0x71d   : > { %v1060_v3 = vpop.f32.mrf.mxu1 }
 0x71e   : > { %v1061_v4 = vadd.f32 %v1222_v9, %v1060_v3  ;;  %v1070_v5 = vsel %vm487_vm2, %v1064_v2, 0.0 }
 0x71f   : > { %1071 = vadd.xlane.f32.xlu0 %v1070_v5  ;;  %v1338_v6 = vpop.f32.mrf.mxu1 }
 0x720   : > { %v1065_v7 = vadd.f32 %v1061_v4, %v873_v48 }
 0x722   : > { %v1073_v8 = vsel %vm487_vm2, %v1065_v7, 0.0 }
 0x723   : > { %1074 = vadd.xlane.f32.xlu1 %v1073_v8 }
 0x7a8   : > { %v1072_v10 = vpop.xlane.xlu0 %1071 }
 0x7a9   : > { %v1076_v13 = vmul.f32 0.03125, %v1072_v10 }
 0x7ab   : > { %v1078_v14 = vsub.f32 %v1064_v2, %v1076_v13 }
 0x7ac   : > { %v1075_v15 = vpop.xlane.xlu1 %1074 }
 0x7ad   : > { %v1077_v16 = vmul.f32 0.03125, %v1075_v15  ;;  %v1080_v17 = vmul.f32 %v1078_v14, %v1078_v14 }
 0x7af   : > { %v1079_v18 = vsub.f32 %v1065_v7, %v1077_v16  ;;  %v1082_v19 = vsel %vm487_vm2, %v1080_v17, 0.0 }
 0x7b0   : > { %1083 = vadd.xlane.f32.xlu0 %v1082_v19 }
 0x7b1   : > { %v1081_v20 = vmul.f32 %v1079_v18, %v1079_v18 }
 0x7b3   : > { %v1085_v21 = vsel %vm487_vm2, %v1081_v20, 0.0 }
 0x7b4   : > { %1086 = vadd.xlane.f32.xlu1 %v1085_v21 }
 0x839   : > { %v1084_v22 = vpop.xlane.xlu0 %1083 }
 0x83a   : > { %v1088_v11 = vmul.f32 0.03125, %v1084_v22 }
 0x83c   : > { %v1090_v23 = vadd.f32 1e-05, %v1088_v11 }
 0x83d   : > { %v1087_v24 = vpop.xlane.xlu1 %1086 }
 0x83e   : > { %1402 = vrsqrt.f32 %v1090_v23  ;;  %v1089_v25 = vmul.f32 0.03125, %v1087_v24 }
 0x840   : > { %v1091_v26 = vadd.f32 1e-05, %v1089_v25 }
 0x842   : > { %1404 = vrsqrt.f32 %v1091_v26 }
 0x84b   : > { %v1403_v12 = vpop.eup %1402 }
 0x84c   : > { %v1094_v28 = vmul.f32 %v1403_v12, %v1078_v14 }
 0x84e   : > { %v1102_v30 = vmul.f32 %v1231_v27, %v1094_v28 }
 0x84f   : > { %v1405_v31 = vpop.eup %1404 }
 0x850   : > { %v1095_v32 = vmul.f32 %v1405_v31, %v1079_v18  ;;  %v1110_v33 = vadd.f32 %v1232_v29, %v1102_v30 }
 0x852   : > { %v1103_v34 = vmul.f32 %v1231_v27, %v1095_v32  ;;  %1112 = vst.msk [vmem:[#allocation2] sm:$0xff] %vm487_vm2, %v1110_v33 }
 0x854   : > { %v1111_v35 = vadd.f32 %v1232_v29, %v1103_v34 }
 0x856   : > { %1113 = vst.msk [vmem:[#allocation2 + $0x8] sm:$0xff] %vm487_vm2, %v1111_v35 }
 0x857   : > { %1419 = shalt.err (!%p1416_p12)
}
 0x858   : > { %s1463_s21 = smov 128   ;;  %s1464_s28 = smov 8  }
 0x859   : > { %1340 = dma.vmem_to_hbm [thread:$0]  (%p1693_p5), %s1124_s19, 256, %s1731_s13, [#allocation3], %s1463_s21, %s1463_s21, %s1464_s28  }
 0x85a   : > { %1443 = dma.done.wait (%p1693_p5), [#allocation3], 256  }
 0x85b   : > { %1445 = vsyncadd (%p1693_p5), [#allocation3], 4294967040 }
 0x85c PF: > { %s24_s27 = sadd.s32 1, %s1456_s27   ;;  %s1733_s25 = smov %s1452_s26 }
 0x85d   : > { %p21_p13 = scmp.ge.s32.totalorder %s24_s27, 4   ;;  %s1734_s26 = smov %s1736_s29 }
 0x85f   :  { %23 = sbr.rel (!%p21_p13) target bundleno = 2 (0x2), region = 115 }
 0x864   :  { %1139 = vsyncpa [#allocation3], 1 }
 0x865   :  { %1141 = vsyncpa [#allocation3 + $0x1], 1 }

</bundles_post_ra>
